<compile_context>
chip_gen: v5e
topology: v5e:2x2
jax: 0.10.0
libtpu: 0.0.40
codegen_flags: <defaults>
</compile_context>

<pallas_src>
import math

import jax
import jax.numpy as jnp
from jax.experimental import pallas as pl
from jax.experimental.pallas import tpu as pltpu

IN_FEATURES = 28 * 28          # 784 (kernel contracts K=784 directly)
HIDDEN = 128
OUT_FEATURES = 10
OUT_PAD = 128                  # lane-dense output width

# f32 x tile: 2048*784*4B = 6.4 MB * 2 buffers + bf16 out tile 0.5 MB * 2
# + weights ~0.5 MB  ->  ~14.4 MB, inside the 32 MiB scoped VMEM default on
# every generation (v5e / v6e / v7x).
DEFAULT_TB = 2048


def _round_up(x, m):
    return ((x + m - 1) // m) * m


def _choose_batch_tile(batch, tb):
    """Pick a batch tile that (a) is a legal block dim (multiple of 8 or the
    full batch), (b) gives >= 2 grid steps whenever possible so the
    'parallel' axis shards across both v7x TensorCores, and (c) never pads
    the batch by more than one ragged tail block."""
    if batch <= 8:
        return batch                       # single block == full dim (legal)
    half = _round_up((batch + 1) // 2, 8)  # aim for at least 2 grid steps
    return min(tb, half)


def _mlp_kernel(x_ref, w1_ref, b1_ref, w2_ref, b2_ref, out_ref):
    # x_ref:  (TB, 784)  f32    VMEM (per-step tile; cast to bf16 here)
    # w1_ref: (784, 128) bf16   VMEM (grid-invariant, no double buffer needed)
    # b1_ref: (1, 128)   f32    VMEM (grid-invariant)
    # w2_ref: (128, 128) bf16   VMEM (zero-padded cols 10..127, grid-invariant)
    # b2_ref: (1, 128)   f32    VMEM (zero-padded, grid-invariant)
    # out_ref:(TB, 128)  bf16   VMEM (f32 accumulate, bf16 store)
    x = x_ref[...].astype(jnp.bfloat16)                 # VPU cast, hidden under DMA/MXU
    h = jnp.dot(x, w1_ref[...], preferred_element_type=jnp.float32)
    h = jnp.maximum(h + b1_ref[...], 0.0)               # bias + ReLU in f32
    y = jnp.dot(h.astype(jnp.bfloat16), w2_ref[...],
                preferred_element_type=jnp.float32)
    out_ref[...] = (y + b2_ref[...]).astype(out_ref.dtype)


def simple_nn_forward(x, w1, b1, w2, b2, *, tb=DEFAULT_TB):
    """Forward pass of SimpleNN.

    x: any shape whose trailing dims flatten to 784 per row (e.g. (B,1,28,28)).
    w1: (784,128) f32, b1: (1,128) f32, w2: (128,10) f32, b2: (1,10) f32.
    Returns (B, 10) float32 logits.
    """
    x2d = x.reshape(-1, IN_FEATURES)            # == torch .view(-1, 784); free reshape
    batch = x2d.shape[0]

    # Weights are tiny (~0.25 MB): pad the head to 128 lanes and cast to bf16
    # in the wrapper (one-time, negligible).  x itself is NOT touched.
    w1_bf = w1.astype(jnp.bfloat16)
    w2_bf = jnp.pad(w2, ((0, 0), (0, OUT_PAD - OUT_FEATURES))).astype(jnp.bfloat16)
    b1_f = b1.astype(jnp.float32)
    b2_f = jnp.pad(b2, ((0, 0), (0, OUT_PAD - OUT_FEATURES))).astype(jnp.float32)

    tb_eff = _choose_batch_tile(batch, tb)
    grid = (pl.cdiv(batch, tb_eff),)            # ragged tail handled by masking

    cost = pl.CostEstimate(
        flops=2 * batch * IN_FEATURES * HIDDEN + 2 * batch * HIDDEN * OUT_PAD,
        transcendentals=0,
        bytes_accessed=(x2d.size * 4                       # f32 input stream
                        + w1_bf.size * 2 + w2_bf.size * 2
                        + b1_f.size * 4 + b2_f.size * 4
                        + batch * OUT_PAD * 2),             # bf16 output stream
    )

    out_padded = pl.pallas_call(
        _mlp_kernel,
        out_shape=jax.ShapeDtypeStruct((batch, OUT_PAD), jnp.bfloat16),
        grid=grid,
        in_specs=[
            pl.BlockSpec((tb_eff, IN_FEATURES), lambda i: (i, 0)),   # x: streamed tile
            # grid-invariant operands (constant index_map) — no double buffer needed
            pl.BlockSpec((IN_FEATURES, HIDDEN), lambda i: (0, 0)),   # w1
            pl.BlockSpec((1, HIDDEN), lambda i: (0, 0)),             # b1
            pl.BlockSpec((HIDDEN, OUT_PAD), lambda i: (0, 0)),       # w2 (padded)
            pl.BlockSpec((1, OUT_PAD), lambda i: (0, 0)),            # b2 (padded)
        ],
        out_specs=pl.BlockSpec((tb_eff, OUT_PAD), lambda i: (i, 0)),
        compiler_params=pltpu.CompilerParams(
            dimension_semantics=("parallel",),               # megacore split on v7x
        ),
        cost_estimate=cost,
    )(x2d, w1_bf, b1_f, w2_bf, b2_f)

    # Strip the lane padding of the head and return f32 logits (torch parity).
    # If the consumer can take the padded bf16 slab, drop this slice entirely.
    return out_padded[:, :OUT_FEATURES].astype(jnp.float32)


def init_params(key):
    """Deterministic init matching nn.Linear's default U(-1/sqrt(fan_in), .)."""
    k1, k2, k3, k4 = jax.random.split(key, 4)
    bound1 = 1.0 / math.sqrt(IN_FEATURES)
    bound2 = 1.0 / math.sqrt(HIDDEN)
    # stored transposed relative to torch: (in, out) so the kernel does x @ W
    w1 = jax.random.uniform(k1, (IN_FEATURES, HIDDEN), jnp.float32, -bound1, bound1)
    b1 = jax.random.uniform(k2, (1, HIDDEN), jnp.float32, -bound1, bound1)
    w2 = jax.random.uniform(k3, (HIDDEN, OUT_FEATURES), jnp.float32, -bound2, bound2)
    b2 = jax.random.uniform(k4, (1, OUT_FEATURES), jnp.float32, -bound2, bound2)
    return w1, b1, w2, b2


if __name__ == "__main__":
    key = jax.random.PRNGKey(0)
    kx, kp, kx2 = jax.random.split(key, 3)

    w1, b1, w2, b2 = init_params(kp)

    # MNIST-like NCHW input: batch=2, 1 channel, 28x28  (single-block path)
    x = jax.random.normal(kx, (2, 1, 28, 28), jnp.float32)
    out = jax.block_until_ready(simple_nn_forward(x, w1, b1, w2, b2))
    assert out.shape == (2, OUT_FEATURES)

    ref_f32 = jnp.maximum(x.reshape(-1, IN_FEATURES) @ w1 + b1, 0.0) @ w2 + b2
    assert jnp.allclose(out, ref_f32, atol=5e-2, rtol=5e-2), (
        float(jnp.max(jnp.abs(out - ref_f32))))

    # Ragged multi-step grid path: batch=20 -> tile 16, grid=(2,), masked tail.
    x2 = jax.random.normal(kx2, (20, 1, 28, 28), jnp.float32)
    out2 = jax.block_until_ready(simple_nn_forward(x2, w1, b1, w2, b2))
    assert out2.shape == (20, OUT_FEATURES)
    ref2 = jnp.maximum(x2.reshape(-1, IN_FEATURES) @ w1 + b1, 0.0) @ w2 + b2
    assert jnp.allclose(out2, ref2, atol=5e-2, rtol=5e-2), (
        float(jnp.max(jnp.abs(out2 - ref2))))

    print("KERNEL_OK")
</pallas_src>

<mosaic_0001>
module attributes {stable_mosaic.version = 11 : i64} {
  func.func @_mlp_kernel(%arg0: i32, %arg1: memref<2x784xf32, #tpu.memory_space<vmem>>, %arg2: memref<784x128xbf16, #tpu.memory_space<vmem>>, %arg3: memref<1x128xf32, #tpu.memory_space<vmem>>, %arg4: memref<128x128xbf16, #tpu.memory_space<vmem>>, %arg5: memref<1x128xf32, #tpu.memory_space<vmem>>, %arg6: memref<2x128xbf16, #tpu.memory_space<vmem>>) attributes {dimension_semantics = [#tpu.dimension_semantics<parallel>], iteration_bounds = array<i64: 1>, scalar_prefetch = 0 : i64, scratch_operands = 0 : i64, tpu.core_type = #tpu.core_type<tc>, window_params = [{transform_indices = @transform_0, window_bounds = array<i64: 2, 784>}, {pipeline_mode = #tpu.pipeline_mode<synchronous>, transform_indices = @transform_1, window_bounds = array<i64: 784, 128>}, {pipeline_mode = #tpu.pipeline_mode<synchronous>, transform_indices = @transform_2, window_bounds = array<i64: 1, 128>}, {pipeline_mode = #tpu.pipeline_mode<synchronous>, transform_indices = @transform_3, window_bounds = array<i64: 128, 128>}, {pipeline_mode = #tpu.pipeline_mode<synchronous>, transform_indices = @transform_4, window_bounds = array<i64: 1, 128>}, {transform_indices = @transform_5, window_bounds = array<i64: 2, 128>}]} {
    %c0 = arith.constant 0 : index
    %c0_0 = arith.constant 0 : index
    %0 = vector.load %arg1[%c0, %c0_0] : memref<2x784xf32, #tpu.memory_space<vmem>>, vector<2x784xf32>
    %1 = arith.truncf %0 : vector<2x784xf32> to vector<2x784xbf16>
    %c0_1 = arith.constant 0 : index
    %c0_2 = arith.constant 0 : index
    %2 = vector.load %arg2[%c0_1, %c0_2] : memref<784x128xbf16, #tpu.memory_space<vmem>>, vector<784x128xbf16>
    %cst = arith.constant dense<0.000000e+00> : vector<2x128xf32>
    %3 = tpu.matmul %1, %2, %cst {dimension_numbers = #tpu.dot_dimension_numbers<[1], [0], [0], [1], [0, 0, 1, 1], [], []>} : vector<2x784xbf16>, vector<784x128xbf16>, vector<2x128xf32> -> vector<2x128xf32>
    %c0_3 = arith.constant 0 : index
    %c0_4 = arith.constant 0 : index
    %4 = vector.load %arg3[%c0_3, %c0_4] : memref<1x128xf32, #tpu.memory_space<vmem>>, vector<1x128xf32>
    %5 = vector.broadcast %4 : vector<1x128xf32> to vector<2x128xf32>
    %6 = arith.addf %3, %5 : vector<2x128xf32>
    %cst_5 = arith.constant 0.000000e+00 : f32
    %7 = vector.broadcast %cst_5 : f32 to vector<2x128xf32>
    %8 = arith.maximumf %6, %7 : vector<2x128xf32>
    %9 = arith.truncf %8 : vector<2x128xf32> to vector<2x128xbf16>
    %c0_6 = arith.constant 0 : index
    %c0_7 = arith.constant 0 : index
    %10 = vector.load %arg4[%c0_6, %c0_7] : memref<128x128xbf16, #tpu.memory_space<vmem>>, vector<128x128xbf16>
    %cst_8 = arith.constant dense<0.000000e+00> : vector<2x128xf32>
    %11 = tpu.matmul %9, %10, %cst_8 {dimension_numbers = #tpu.dot_dimension_numbers<[1], [0], [0], [1], [0, 0, 1, 1], [], []>} : vector<2x128xbf16>, vector<128x128xbf16>, vector<2x128xf32> -> vector<2x128xf32>
    %c0_9 = arith.constant 0 : index
    %c0_10 = arith.constant 0 : index
    %12 = vector.load %arg5[%c0_9, %c0_10] : memref<1x128xf32, #tpu.memory_space<vmem>>, vector<1x128xf32>
    %13 = vector.broadcast %12 : vector<1x128xf32> to vector<2x128xf32>
    %14 = arith.addf %11, %13 : vector<2x128xf32>
    %15 = arith.truncf %14 : vector<2x128xf32> to vector<2x128xbf16>
    %c0_11 = arith.constant 0 : index
    %c0_12 = arith.constant 0 : index
    %16 = vector.load %arg6[%c0_11, %c0_12] : memref<2x128xbf16, #tpu.memory_space<vmem>>, vector<2x128xbf16>
    tpu.vector_store %arg6[%c0_11, %c0_12], %15 {strides = array<i32>} : memref<2x128xbf16, #tpu.memory_space<vmem>>, vector<2x128xbf16>,
    return
  }
  func.func @transform_0(%arg0: i32) -> (i32, i32) {
    %c0_i32 = arith.constant 0 : i32
    %c0_i32_0 = arith.constant 0 : i32
    return %arg0, %c0_i32 : i32, i32
  }
  func.func @transform_1(%arg0: i32) -> (i32, i32) {
    %c0_i32 = arith.constant 0 : i32
    %c0_i32_0 = arith.constant 0 : i32
    %c0_i32_1 = arith.constant 0 : i32
    return %c0_i32, %c0_i32_0 : i32, i32
  }
  func.func @transform_2(%arg0: i32) -> (i32, i32) {
    %c0_i32 = arith.constant 0 : i32
    %c0_i32_0 = arith.constant 0 : i32
    %c0_i32_1 = arith.constant 0 : i32
    return %c0_i32, %c0_i32_0 : i32, i32
  }
  func.func @transform_3(%arg0: i32) -> (i32, i32) {
    %c0_i32 = arith.constant 0 : i32
    %c0_i32_0 = arith.constant 0 : i32
    %c0_i32_1 = arith.constant 0 : i32
    return %c0_i32, %c0_i32_0 : i32, i32
  }
  func.func @transform_4(%arg0: i32) -> (i32, i32) {
    %c0_i32 = arith.constant 0 : i32
    %c0_i32_0 = arith.constant 0 : i32
    %c0_i32_1 = arith.constant 0 : i32
    return %c0_i32, %c0_i32_0 : i32, i32
  }
  func.func @transform_5(%arg0: i32) -> (i32, i32) {
    %c0_i32 = arith.constant 0 : i32
    %c0_i32_0 = arith.constant 0 : i32
    return %arg0, %c0_i32 : i32, i32
  }
}

</mosaic_0001>

<bundles_post_ra>
// kernel: tpu_custom_call.1
= control target key start
LH: loop header
LB: loop body
LE: loop exit
PB: predicated region body
PF: predicated region fallthrough
CT: control target
= control target key end

     0   :  { %10 = vsyncpa [#allocation3], 0  ;;  %s1139_s0 = inlined_call_operand.hbm [shape: f32[2,784], index: 0, kind: input, shape index: {}]   ;;  %s1140_s1 = inlined_call_operand.hbm [shape: bf16[784,128], index: 1, kind: input, shape index: {}]   ;;  %s1141_s2 = inlined_call_operand.vmem [shape: f32[1,128], index: 2, kind: input, shape index: {}]   ;;  %s1142_s3 = inlined_call_operand.hbm [shape: bf16[128,128], index: 3, kind: input, shape index: {}]   ;;  %s1143_s4 = inlined_call_operand.vmem [shape: f32[1,128], index: 4, kind: input, shape index: {}]   ;;  %s1144_s5 = inlined_call_operand.hbm [shape: bf16[2,128], index: 5, kind: output, shape index: {}]  }
   0x1   :  { %11 = vsyncpa [#allocation6], 0  ;;  %s28_s20 = sshll.u32 %s1140_s1, 4  ;;  %s29_s20 = int_to_ptr.hbm [resolvable:$true] %s28_s20 }
   0x2   :  { %12 = vsyncpa [#allocation4], 0  ;;  %s1085_s21 = smov [#allocation5]   ;;  %s18_s25 = sshll.u32 %s1139_s0, 4  ;;  %s19_s25 = int_to_ptr.hbm [resolvable:$true] %s18_s25 }
   0x3   :  { %s30_s22 = sshll.u32 %s1085_s21, 4  ;;  %s1086_s26 = smov 64   ;;  %s31_s22 = int_to_ptr.vmem [resolvable:$true] %s30_s22 }
   0x4   :  { %s1087_s27 = smov 4   ;;  %s1088_s28 = smov [#allocation2]  }
   0x5   :  { %36 = dma.hbm_to_vmem [thread:$0]  %s29_s20, 6272, %s31_s22, [#allocation6], %s1086_s26, %s1086_s26, %s1087_s27  }
   0x6   :  { %s20_s29 = sshll.u32 %s1088_s28, 4  ;;  %s43_s7 = sshll.u32 %s1142_s3, 4  ;;  %s21_s29 = int_to_ptr.vmem [resolvable:$true] %s20_s29  ;;  %s44_s7 = int_to_ptr.hbm [resolvable:$true] %s43_s7 }
   0x7   :  { %23 = dma.hbm_to_vmem [thread:$0]  %s19_s25, 224, %s21_s29, [#allocation3]  }
   0x8   :  { %s1089_s1 = smov [#allocation7]  }
   0x9   :  { %s45_s8 = sshll.u32 %s1089_s1, 4  ;;  %s46_s8 = int_to_ptr.vmem [resolvable:$true] %s45_s8 }
   0xa   :  { %51 = dma.hbm_to_vmem [thread:$0]  %s44_s7, 1024, %s46_s8, [#allocation6], %s1086_s26, %s1086_s26, %s1087_s27  }
   0xb   :  { %1079 = dma.done.wait [#allocation3], 224  }
   0xc   :  { %1080 = vsyncadd [#allocation3], 4294967072 }
   0xd   :  { %1081 = dma.done.wait [#allocation6], 7296  }
   0xe   :  { %1082 = vsyncadd [#allocation6], 4294960000  ;;  %v925_v0 = vld [vmem:[#allocation5 + $0x38] sm:$0xff]  ;;  %v924_v3 = vld [vmem:[#allocation5 + $0x30] sm:$0xff]  ;;  %vm491_vm0 = vcmask 130048   ;;  %s1090_s10 = smov [#allocation8]  }
   0xf   :  { %v933_v1 = vld [vmem:[#allocation5 + $0x78] sm:$0xff]  ;;  %495 = vmatpush.bf16.msra.mxu0 %v925_v0  ;;  %v932_v4 = vld [vmem:[#allocation5 + $0x70] sm:$0xff]  ;;  %v923_v8 = vld [vmem:[#allocation5 + $0x28] sm:$0xff]  ;;  %s676_s11 = sshll.u32 %s1090_s10, 4  ;;  %s678_s14 = sshll.u32 %s1144_s5, 4  ;;  %s677_s11 = int_to_ptr.vmem [resolvable:$true] %s676_s11  ;;  %s679_s14 = int_to_ptr.hbm [resolvable:$true] %s678_s14 }
  0x10   :  { %v941_v2 = vld [vmem:[#allocation5 + $0xb8] sm:$0xff]  ;;  %508 = vmatpush.bf16.msra.mxu1 %v933_v1  ;;  %v940_v5 = vld [vmem:[#allocation5 + $0xb0] sm:$0xff]  ;;  %v931_v9 = vld [vmem:[#allocation5 + $0x68] sm:$0xff] }
  0x11   :  { %521 = vmatpush.bf16.msra.mxu2 %v941_v2  ;;  %v949_v6 = vld [vmem:[#allocation5 + $0xf8] sm:$0xff]  ;;  %v948_v7 = vld [vmem:[#allocation5 + $0xf0] sm:$0xff]  ;;  %v939_v10 = vld [vmem:[#allocation5 + $0xa8] sm:$0xff] }
  0x12   :  { %534 = vmatpush.bf16.msra.mxu3 %v949_v6  ;;  %v947_v11 = vld [vmem:[#allocation5 + $0xe8] sm:$0xff]  ;;  %v922_v12 = vld [vmem:[#allocation5 + $0x20] sm:$0xff]  ;;  %v67_v15 = vld [vmem:[#allocation2] sm:$0xff] }
  0x13   :  { %496 = vmatpush.bf16.msra.mxu0 %v924_v3  ;;  %v930_v13 = vld [vmem:[#allocation5 + $0x60] sm:$0xff]  ;;  %71 = vst [vmem:[#allocation1] ss:$4 sm:$0xff] %v67_v15  ;;  %v921_v17 = vld [vmem:[#allocation5 + $0x18] sm:$0xff]  ;;  %v920_v22 = vld [vmem:[#allocation5 + $0x10] sm:$0xff] }
  0x14   :  { %509 = vmatpush.bf16.msra.mxu1 %v932_v4  ;;  %v938_v14 = vld [vmem:[#allocation5 + $0xa0] sm:$0xff]  ;;  %v929_v18 = vld [vmem:[#allocation5 + $0x58] sm:$0xff]  ;;  %v928_v23 = vld [vmem:[#allocation5 + $0x50] sm:$0xff] }
  0x15   :  { %522 = vmatpush.bf16.msra.mxu2 %v940_v5  ;;  %v946_v16 = vld [vmem:[#allocation5 + $0xe0] sm:$0xff]  ;;  %v68_v19 = vld [vmem:[#allocation2 + $0x8] sm:$0x3f]  ;;  %v936_v24 = vld [vmem:[#allocation5 + $0x90] sm:$0xff] }
  0x16   :  { %535 = vmatpush.bf16.msra.mxu3 %v948_v7  ;;  %v937_v20 = vld [vmem:[#allocation5 + $0x98] sm:$0xff]  ;;  %73 = vst [vmem:[#allocation1 + $0x20] ss:$4 sm:$0xff] %v68_v19  ;;  %v944_v25 = vld [vmem:[#allocation5 + $0xd0] sm:$0xff]  ;;  %v919_v26 = vld [vmem:[#allocation5 + $0x8] sm:$0xff] }
  0x17   :  { %497 = vmatpush.bf16.msra.mxu0 %v923_v8  ;;  %v945_v21 = vld [vmem:[#allocation5 + $0xd8] sm:$0xff]  ;;  %v927_v27 = vld [vmem:[#allocation5 + $0x48] sm:$0xff]  ;;  %v918_v29 = vld [vmem:[#allocation5] sm:$0xff] }
  0x18   :  { %510 = vmatpush.bf16.msra.mxu1 %v931_v9  ;;  %v935_v28 = vld [vmem:[#allocation5 + $0x88] sm:$0xff]  ;;  %v926_v30 = vld [vmem:[#allocation5 + $0x40] sm:$0xff]  ;;  %v957_v34 = vld [vmem:[#allocation5 + $0x138] sm:$0xff] }
  0x19   :  { %523 = vmatpush.bf16.msra.mxu2 %v939_v10  ;;  %v943_v31 = vld [vmem:[#allocation5 + $0xc8] sm:$0xff]  ;;  %v965_v35 = vld [vmem:[#allocation5 + $0x178] sm:$0xff]  ;;  %v934_v36 = vld [vmem:[#allocation5 + $0x80] sm:$0xff] }
  0x1a   :  { %536 = vmatpush.bf16.msra.mxu3 %v947_v11  ;;  %v74_v32 = vld.sshfl [vmem:[#allocation1] sm:$0xff pattern:$0x73625140]  ;;  %v75_v33 = vld.sshfl [vmem:[#allocation1 + $0x8] sm:$0xff pattern:$0x73625140] }
  0x1b   :  { %498 = vmatpush.bf16.msra.mxu0 %v922_v12  ;;  %v76_v37 = vld.sshfl [vmem:[#allocation1 + $0x10] sm:$0xff pattern:$0x73625140]  ;;  %v88_v38 = vpack.c.bf16 %v74_v32, %v74_v32  ;;  %v89_v39 = vpack.c.bf16 %v75_v33, %v75_v33  ;;  %v77_v42 = vld.sshfl [vmem:[#allocation1 + $0x18] sm:$0xff pattern:$0x73625140] }
  0x1c   :  { %511 = vmatpush.bf16.msra.mxu1 %v930_v13  ;;  %v942_v40 = vld [vmem:[#allocation5 + $0xc0] sm:$0xff]  ;;  %v956_v43 = vld [vmem:[#allocation5 + $0x130] sm:$0xff]  ;;  %v90_v45 = vpack.c.bf16 %v76_v37, %v76_v37  ;;  %v91_v46 = vpack.c.bf16 %v77_v42, %v77_v42  ;;  %v955_v47 = vld [vmem:[#allocation5 + $0x128] sm:$0xff] }
  0x1d   :  { %524 = vmatpush.bf16.msra.mxu2 %v938_v14  ;;  %v966_v41 = vld [vmem:[#allocation5 + $0x180] sm:$0xff]  ;;  %v964_v44 = vld [vmem:[#allocation5 + $0x170] sm:$0xff]  ;;  %v963_v48 = vld [vmem:[#allocation5 + $0x168] sm:$0xff] }
  0x1e   :  { %537 = vmatpush.bf16.msra.mxu3 %v946_v16  ;;  %v954_v49 = vld [vmem:[#allocation5 + $0x120] sm:$0xff]  ;;  %v953_v51 = vld [vmem:[#allocation5 + $0x118] sm:$0xff]  ;;  %v952_v54 = vld [vmem:[#allocation5 + $0x110] sm:$0xff] }
  0x1f   :  { %499 = vmatpush.bf16.msra.mxu0 %v921_v17  ;;  %v962_v50 = vld [vmem:[#allocation5 + $0x160] sm:$0xff]  ;;  %v961_v52 = vld [vmem:[#allocation5 + $0x158] sm:$0xff]  ;;  %v960_v55 = vld [vmem:[#allocation5 + $0x150] sm:$0xff] }
  0x20   :  { %512 = vmatpush.bf16.msra.mxu1 %v929_v18  ;;  %v80_v53 = vld.sshfl [vmem:[#allocation1 + $0x30] sm:$0xff pattern:$0x73625140]  ;;  %v951_v57 = vld [vmem:[#allocation5 + $0x108] sm:$0xff]  ;;  %v972_v3 = vld [vmem:[#allocation7 + $0x28] sm:$0xff] }
  0x21   :  { %525 = vmatpush.bf16.msra.mxu2 %v937_v20  ;;  %v94_v56 = vpack.c.bf16 %v80_v53, %v80_v53  ;;  %v959_v58 = vld [vmem:[#allocation5 + $0x148] sm:$0xff]  ;;  %v950_v59 = vld [vmem:[#allocation5 + $0x100] sm:$0xff]  ;;  %v79_v62 = vld.sshfl [vmem:[#allocation1 + $0x28] sm:$0xff pattern:$0x73625140] }
  0x22   :  { %538 = vmatpush.bf16.msra.mxu3 %v945_v21  ;;  %v958_v60 = vld [vmem:[#allocation5 + $0x140] sm:$0xff]  ;;  %v78_v61 = vld.sshfl [vmem:[#allocation1 + $0x20] sm:$0xff pattern:$0x73625140]  ;;  %v93_v0 = vpack.c.bf16 %v79_v62, %v79_v62  ;;  %v973_v2 = vld [vmem:[#allocation7 + $0x30] sm:$0xff] }
  0x23   :  { %500 = vmatpush.bf16.msra.mxu0 %v920_v22  ;;  %v92_v63 = vpack.c.bf16 %v78_v61, %v78_v61  ;;  %v974_v1 = vld [vmem:[#allocation7 + $0x38] sm:$0xff]  ;;  %v971_v4 = vld [vmem:[#allocation7 + $0x20] sm:$0xff]  ;;  %v969_v6 = vld [vmem:[#allocation7 + $0x10] sm:$0xff] }
  0x24   :  { %513 = vmatpush.bf16.msra.mxu1 %v928_v23  ;;  %v970_v5 = vld [vmem:[#allocation7 + $0x18] sm:$0xff]  ;;  %v968_v7 = vld [vmem:[#allocation7 + $0x8] sm:$0xff]  ;;  %v967_v10 = vld [vmem:[#allocation7] sm:$0xff] }
  0x25   :  { %526 = vmatpush.bf16.msra.mxu2 %v936_v24  ;;  %v981_v15 = vld [vmem:[%s1141_s2] ss:$0 sm:$0xff] }
  0x26   :  { %539 = vmatpush.bf16.msra.mxu3 %v944_v25  ;;  %v982_v33 = vld [vmem:[%s1143_s4] ss:$0 sm:$0xff] }
  0x27   :  { %501 = vmatpush.bf16.msra.mxu0 %v919_v26 }
  0x28   :  { %514 = vmatpush.bf16.msra.mxu1 %v927_v27 }
  0x29   :  { %527 = vmatpush.bf16.msra.mxu2 %v935_v28 }
  0x2a   :  { %540 = vmatpush.bf16.msra.mxu3 %v943_v31 }
  0x2b   :  { %502 = vmatpush.bf16.msra.mxu0 %v918_v29 }
  0x2c   :  { %515 = vmatpush.bf16.msra.mxu1 %v926_v30 }
  0x2d   :  { %528 = vmatpush.bf16.msra.mxu2 %v934_v36 }
  0x2e   :  { %503 = vmatmul.bf16.vlgmr.msra.gmra.mxu0 %v88_v38  ;;  %541 = vmatpush.bf16.msra.mxu3 %v942_v40 }
  0x2f   :  { %547 = vmatpush.bf16.msrb.mxu0 %v957_v34  ;;  %516 = vmatmul.bf16.vlgmr.msra.gmra.mxu1 %v89_v39 }
  0x30   :  { %560 = vmatpush.bf16.msrb.mxu1 %v965_v35  ;;  %529 = vmatmul.bf16.vlgmr.msra.gmra.mxu2 %v90_v45 }
  0x31   :  { %580 = vmatpush.bf16.msrb.mxu2 %v966_v41  ;;  %542 = vmatmul.bf16.vlgmr.msra.gmra.mxu3 %v91_v46 }
  0x32   :  { %656 = vmatpush.bf16.msrb.mxu3 %v974_v1 }
  0x33   :  { %548 = vmatpush.bf16.msrb.mxu0 %v956_v43 }
  0x34   :  { %561 = vmatpush.bf16.msrb.mxu1 %v964_v44 }
  0x36   :  { %657 = vmatpush.bf16.msrb.mxu3 %v973_v2 }
  0x37   :  { %549 = vmatpush.bf16.msrb.mxu0 %v955_v47 }
  0x38   :  { %562 = vmatpush.bf16.msrb.mxu1 %v963_v48 }
  0x3a   :  { %658 = vmatpush.bf16.msrb.mxu3 %v972_v3 }
  0x3b   :  { %550 = vmatpush.bf16.msrb.mxu0 %v954_v49 }
  0x3c   :  { %563 = vmatpush.bf16.msrb.mxu1 %v962_v50 }
  0x3e   :  { %659 = vmatpush.bf16.msrb.mxu3 %v971_v4 }
  0x3f   :  { %551 = vmatpush.bf16.msrb.mxu0 %v953_v51 }
  0x40   :  { %564 = vmatpush.bf16.msrb.mxu1 %v961_v52  ;;  %885 = vmatmul.msk.bf16.vlgmr.msrb.gmra.mxu2 %vm491_vm0, %v94_v56 }
  0x42   :  { %660 = vmatpush.bf16.msrb.mxu3 %v970_v5 }
  0x43   :  { %552 = vmatpush.bf16.msrb.mxu0 %v952_v54 }
  0x44   :  { %565 = vmatpush.bf16.msrb.mxu1 %v960_v55 }
  0x46   :  { %661 = vmatpush.bf16.msrb.mxu3 %v969_v6 }
  0x47   :  { %553 = vmatpush.bf16.msrb.mxu0 %v951_v57 }
  0x48   :  { %566 = vmatpush.bf16.msrb.mxu1 %v959_v58 }
  0x4a   :  { %662 = vmatpush.bf16.msrb.mxu3 %v968_v7 }
  0x4b   :  { %554 = vmatpush.bf16.msrb.mxu0 %v950_v59 }
  0x4c   :  { %567 = vmatpush.bf16.msrb.mxu1 %v958_v60 }
  0x4e   :  { %555 = vmatmul.bf16.vlgmr.msrb.gmra.mxu0 %v92_v63  ;;  %663 = vmatpush.bf16.msrb.mxu3 %v967_v10 }
  0x4f   :  { %568 = vmatmul.bf16.vlgmr.msrb.gmra.mxu1 %v93_v0 }
  0xab   :  { %v504_v8 = vpop.f32.mrf.mxu0 }
  0xac   :  { %v517_v9 = vpop.f32.mrf.mxu1  ;;  %v505_v16 = vadd.f32 %v981_v15, %v504_v8 }
  0xae   :  { %v518_v19 = vadd.f32 %v517_v9, %v505_v16 }
  0xb3   :  { %v506_v11 = vpop.f32.mrf.mxu0  ;;  %v530_v13 = vpop.f32.mrf.mxu2 }
  0xb4   :  { %v519_v12 = vpop.f32.mrf.mxu1  ;;  %v543_v14 = vpop.f32.mrf.mxu3  ;;  %v531_v20 = vadd.f32 %v530_v13, %v518_v19 }
  0xb6   :  { %v544_v22 = vadd.f32 %v543_v14, %v531_v20 }
  0xbb   :  { %v532_v17 = vpop.f32.mrf.mxu2 }
  0xbc   :  { %v545_v18 = vpop.f32.mrf.mxu3 }
  0xc3   :  { %v582_v21 = vpop.f32.mrf.mxu2 }
  0xcb   :  { %v556_v23 = vpop.f32.mrf.mxu0  ;;  %v584_v27 = vpop.f32.mrf.mxu2 }
  0xcc   :  { %v569_v24 = vpop.f32.mrf.mxu1  ;;  %v557_v25 = vadd.f32 %v556_v23, %v544_v22 }
  0xce   :  { %v570_v26 = vadd.f32 %v569_v24, %v557_v25 }
  0xd0   :  { %v583_v28 = vadd.f32 %v582_v21, %v570_v26 }
  0xd2   :  { %v586_v29 = vmax.f32 %v583_v28, 0.0 }
  0xd3   :  { %v558_v30 = vpop.f32.mrf.mxu0 }
  0xd4   :  { %v571_v31 = vpop.f32.mrf.mxu1  ;;  %v587_v32 = vpack.c.bf16 %v586_v29, %v586_v29 }
  0xd6   :  { %664 = vmatmul.bf16.vlgmr.msrb.gmra.mxu3 %v587_v32 }
 0x159   :  { %v665_v34 = vpop.f32.mrf.mxu3 }
 0x15a   :  { %v666_v35 = vadd.f32 %v982_v33, %v665_v34 }
 0x15c   :  { %v669_v36 = vpack.c.bf16 %v666_v35, %v666_v35 }
 0x15e   :  { %670 = vst [vmem:[#allocation8] sm:$0x1] %v669_v36 }
 0x15f   :  { %681 = dma.vmem_to_hbm [thread:$0]  %s677_s11, 16, %s679_s14, [#allocation4]  }
 0x161   :  { %v667_v37 = vpop.f32.mrf.mxu3 }
 0x162   :  { %1083 = dma.done.wait [#allocation4], 16  }
 0x163   :  { %1084 = vsyncadd [#allocation4], 4294967280 }
 0x164   :  { %686 = vsyncpa [#allocation3], 1 }
 0x165   :  { %687 = vsyncpa [#allocation6], 1 }
 0x166   :  { %688 = vsyncpa [#allocation4], 1 }

</bundles_post_ra>
